<compile_context>
chip_gen: v7x
topology: tpu7x:2x2x1
jax: 0.10.0
libtpu: 0.0.40
codegen_flags: <defaults>
</compile_context>

<pallas_src>
import functools

import jax
import jax.numpy as jnp
from jax.experimental import pallas as pl
from jax.experimental.pallas import tpu as pltpu


def _round_up(x, m):
    return ((x + m - 1) // m) * m


def _cdiv(a, b):
    return -(-a // b)


def _sublane_multiple(dtype):
    """Second-to-last tile-dim multiple for a dtype (8 f32, 16 bf16, 32 int8/fp8)."""
    return max(8, 32 // jnp.dtype(dtype).itemsize)


def _tpu_vmem_capacity_bytes():
    """Physical VMEM per core, with a conservative (v7x-sized) fallback."""
    try:
        return int(pltpu.get_tpu_info().vmem_capacity_bytes)
    except Exception:
        return 64 * 1024 * 1024


_PAD_BIAS = -40.0   # padded output columns hash to exactly -40 -> BCE term ~ exp(-40)


def _lsh_kernel(fs_ref, ft_ref, w_ref, b_ref, out_ref, l2_acc, lsh_acc, *,
                with_l2, lsh_loss):
    """One (TB, D) batch tile; per-core partial sums kept in VMEM vector scratch."""
    i = pl.program_id(1)                      # batch-tile axis ('arbitrary', serial)
    n_inner = pl.num_programs(1)

    @pl.when(i == 0)
    def _init():
        l2_acc[...] = jnp.zeros_like(l2_acc)
        lsh_acc[...] = jnp.zeros_like(lsh_acc)

    fs = fs_ref[...]                          # native dtype (f32 or bf16)
    ft = ft_ref[...]

    # ---- L2 feature-matching term (padded rows are all-zero -> contribute 0). ----
    if with_l2:
        diff = fs.astype(jnp.float32) - ft.astype(jnp.float32)
        l2_acc[...] += jnp.sum(diff * diff, axis=0, keepdims=True)

    # ---- Hash projections: two MXU dots, f32 accumulation, f32 bias add. --------
    w = w_ref[...]
    b = b_ref[...]                            # (1, O_pad) f32; padded lanes = -40
    hash_s = jnp.dot(fs, w, preferred_element_type=jnp.float32) + b
    hash_t = jnp.dot(ft, w, preferred_element_type=jnp.float32) + b

    if lsh_loss == 'BCE':
        # BCEWithLogitsLoss elementwise: max(x,0) - x*y + log1p(exp(-|x|)),
        # pseudo-label y = (hash_t > 0). Padded columns give ~exp(-40) each.
        y = (hash_t > 0).astype(jnp.float32)
        elem = (jnp.maximum(hash_s, 0.0) - hash_s * y
                + jnp.log1p(jnp.exp(-jnp.abs(hash_s))))
    elif lsh_loss == 'L2':
        d = hash_s - hash_t
        elem = d * d                          # padded rows/cols: exactly 0
    elif lsh_loss == 'L1':
        elem = jnp.abs(hash_s - hash_t)       # padded rows/cols: exactly 0
    else:
        raise NotImplementedError(lsh_loss)
    lsh_acc[...] += jnp.sum(elem, axis=0, keepdims=True)

    # ---- Finalize once per core: single cross-lane reduce + output write. -------
    @pl.when(i == n_inner - 1)
    def _finalize():
        l2_sum = jnp.sum(l2_acc[...])
        lsh_sum = jnp.sum(lsh_acc[...])
        col = jax.lax.broadcasted_iota(jnp.int32, out_ref.shape, 1)
        out_ref[...] = jnp.where(col == 0, l2_sum,
                                 jnp.where(col == 1, lsh_sum, 0.0))


def prepare_lsh_params(weight, bias, feature_dtype=jnp.float32):
    """Pre-transpose and lane-pad the frozen projection ONCE (hoist to module init).

    weight: (output_dim, input_dim) nn.Linear layout; bias: (output_dim,).
    Returns (w_pad (D, O_pad) in feature dtype, b_pad (1, O_pad) f32, output_dim).
    Padded bias lanes get a large-negative value so padded columns contribute ~0
    to BCE (exactly 0 to L1/L2) with no in-kernel column mask.
    """
    out_dim, in_dim = weight.shape
    o_pad = _round_up(max(out_dim, 1), 128)
    w_t = jnp.zeros((in_dim, o_pad), dtype=feature_dtype)
    w_t = w_t.at[:, :out_dim].set(jnp.asarray(weight, dtype=feature_dtype).T)
    b = jnp.full((1, o_pad), _PAD_BIAS, dtype=jnp.float32)
    b = b.at[0, :out_dim].set(jnp.asarray(bias, dtype=jnp.float32))
    return w_t, b, out_dim


def lsh_forward_prepared(f_s, f_t, w_pad, bias_pad, out_dim, *,
                         with_l2=True, lsh_loss='BCE', tb=None, num_cores=None):
    """Pallas LSH loss using pre-prepared (lane-padded) projection params."""
    B, D = f_s.shape
    assert f_t.shape == (B, D)
    assert f_t.dtype == f_s.dtype
    o_pad = w_pad.shape[1]
    itemsize = jnp.dtype(f_s.dtype).itemsize
    sub = _sublane_multiple(f_s.dtype)

    vmem_cap = _tpu_vmem_capacity_bytes()
    # 128-MiB-VMEM parts (v5e/v6e) take ~8 MiB feature tiles; 64 MiB (v7x) ~2 MiB.
    tile_budget = (8 << 20) if vmem_cap >= (100 << 20) else (2 << 20)

    if tb is None:
        tb = tile_budget // max(D * itemsize, 1)
    tb = int(max(sub, min(int(tb), 2048)))
    tb = _round_up(tb, sub)
    tb = min(tb, _round_up(B, sub))           # never bigger than the (rounded) batch
    tb = max(tb, sub)

    n_tiles = _cdiv(B, tb)
    if num_cores is None:
        num_cores = 2 if n_tiles >= 2 else 1  # leading 'parallel' axis (megacore)
    num_cores = max(1, min(int(num_cores), n_tiles))
    n_inner = _cdiv(n_tiles, num_cores)
    b_rows = num_cores * n_inner * tb

    def pad_batch(x):
        if b_rows == B:
            return x
        return jnp.pad(x, ((0, b_rows - B), (0, 0)))

    fs_p = pad_batch(f_s)
    ft_p = pad_batch(f_t)

    kernel = functools.partial(_lsh_kernel, with_l2=with_l2, lsh_loss=lsh_loss)

    # VMEM budget: double-buffered feature tiles + W/bias buffers + f32
    # intermediates (diff, hash_s/t, y, elem) + accumulators + slack.
    w_bytes = D * o_pad * jnp.dtype(w_pad.dtype).itemsize
    tile_bytes = tb * D * itemsize
    vmem_est = (4 * tile_bytes                       # fs + ft, double-buffered
                + 2 * w_bytes + 2 * 8 * o_pad * 4    # W + bias buffers
                + 2 * tb * D * 4                     # f32 diff intermediates
                + 6 * tb * o_pad * 4                 # hash_s/t, y, elem
                + 8 * _round_up(D, 128) * 4 + 8 * o_pad * 4   # accumulators
                + 4 * 8 * 128 * 4                    # output blocks
                + (2 << 20))                         # slack
    vmem_limit = int(min(max(vmem_est, 16 << 20), int(0.9 * vmem_cap)))

    flops = 4 * b_rows * D * o_pad + 8 * b_rows * o_pad
    if with_l2:
        flops += 3 * b_rows * D
    cost = pl.CostEstimate(
        flops=flops,
        transcendentals=(2 * b_rows * o_pad) if lsh_loss == 'BCE' else 0,
        bytes_accessed=(2 * b_rows * D * itemsize + w_bytes + o_pad * 4
                        + num_cores * 8 * 128 * 4),
    )

    # TODO(synk): sweep pipeline_mode=pl.Buffered(1) on the constant-index W/bias
    # specs and pl.Buffered(3) on fs/ft for small-D shapes once verified on v7x HW.
    out = pl.pallas_call(
        kernel,
        out_shape=jax.ShapeDtypeStruct((num_cores * 8, 128), jnp.float32),
        grid_spec=pltpu.PrefetchScalarGridSpec(
            num_scalar_prefetch=0,
            grid=(num_cores, n_inner),
            in_specs=[
                pl.BlockSpec((tb, D), lambda c, i: (c * n_inner + i, 0)),   # f_s tile
                pl.BlockSpec((tb, D), lambda c, i: (c * n_inner + i, 0)),   # f_t tile
                pl.BlockSpec((D, o_pad), lambda c, i: (0, 0)),              # W^T (lane-padded)
                pl.BlockSpec((1, o_pad), lambda c, i: (0, 0)),              # bias (lane-padded)
            ],
            out_specs=pl.BlockSpec((8, 128), lambda c, i: (c, 0)),          # per-core partials
            scratch_shapes=[pltpu.VMEM((1, D), jnp.float32),
                            pltpu.VMEM((1, o_pad), jnp.float32)],
        ),
        compiler_params=pltpu.CompilerParams(
            dimension_semantics=("parallel", "arbitrary"),
            vmem_limit_bytes=vmem_limit,
        ),
        cost_estimate=cost,
    )(fs_p, ft_p, w_pad, bias_pad)

    parts = out.reshape(num_cores, 8, 128)
    l2_sum = jnp.sum(parts[:, 0, 0])
    lsh_sum = jnp.sum(parts[:, 0, 1])

    # Padded (all-zero) batch rows hash to exactly the (padded) bias; their BCE
    # contribution is a per-row constant -> subtract it once here instead of
    # row-masking every grid step. L1/L2 padded rows contribute exactly 0.
    n_pad_rows = b_rows - B
    if lsh_loss == 'BCE' and n_pad_rows > 0:
        pad_row = jnp.sum(jnp.log1p(jnp.exp(-jnp.abs(bias_pad[0].astype(jnp.float32)))))
        lsh_sum = lsh_sum - jnp.float32(n_pad_rows) * pad_row

    loss = lsh_sum / jnp.float32(B * out_dim)
    if with_l2:
        loss = loss + l2_sum / jnp.float32(B * D)
    return loss


def lsh_forward(f_s, f_t, weight, bias, *, with_l2=True, lsh_loss='BCE',
                tb=None, num_cores=None):
    """Convenience wrapper: prepares the frozen params then calls the kernel.

    f_s, f_t: (B, input_dim); weight: (output_dim, input_dim); bias: (output_dim,)
    Returns the scalar float32 loss (l2_loss + LSH_loss), matching LSH.forward.
    (In training, hoist prepare_lsh_params out of the step and reuse its result.)
    """
    w_pad, b_pad, out_dim = prepare_lsh_params(weight, bias, feature_dtype=f_s.dtype)
    return lsh_forward_prepared(f_s, f_t, w_pad, b_pad, out_dim,
                                with_l2=with_l2, lsh_loss=lsh_loss, tb=tb,
                                num_cores=num_cores)


def lsh_forward_ref(f_s, f_t, weight, bias, *, with_l2=True, lsh_loss='BCE'):
    """Pure-JAX reference (mirrors the PyTorch module)."""
    f_s = f_s.astype(jnp.float32)
    f_t = f_t.astype(jnp.float32)
    l2 = jnp.mean((f_s - f_t) ** 2) if with_l2 else jnp.float32(0.0)
    w = jnp.asarray(weight, dtype=jnp.float32)
    b = jnp.asarray(bias, dtype=jnp.float32)
    hs = f_s @ w.T + b
    ht = f_t @ w.T + b
    if lsh_loss == 'BCE':
        y = (ht > 0).astype(jnp.float32)
        bce = jnp.maximum(hs, 0.0) - hs * y + jnp.log1p(jnp.exp(-jnp.abs(hs)))
        loss = jnp.mean(bce)
    elif lsh_loss == 'L2':
        loss = jnp.mean((hs - ht) ** 2)
    else:
        loss = jnp.mean(jnp.abs(hs - ht))
    return l2 + loss


if __name__ == "__main__":
    # Case 1: small shapes consistent with the module (batch=8, input_dim=32,
    # output_dim=16); frozen linear init: W ~ N(0, std), bias = 0.
    B, input_dim, output_dim = 8, 32, 16
    std = 1.0
    key = jax.random.PRNGKey(0)
    k_s, k_t, k_w = jax.random.split(key, 3)
    f_s = jax.random.normal(k_s, (B, input_dim), dtype=jnp.float32)
    f_t = f_s + 0.1 * jax.random.normal(k_t, (B, input_dim), dtype=jnp.float32)
    weight = std * jax.random.normal(k_w, (output_dim, input_dim), dtype=jnp.float32)
    bias = jnp.zeros((output_dim,), dtype=jnp.float32)

    loss = lsh_forward(f_s, f_t, weight, bias, with_l2=True, lsh_loss='BCE')
    jax.block_until_ready(loss)
    ref = lsh_forward_ref(f_s, f_t, weight, bias, with_l2=True, lsh_loss='BCE')
    assert jnp.allclose(loss, ref, rtol=1e-4, atol=1e-5), (loss, ref)

    # Case 2: exercise the batch-tiled grid, the 2-way parallel split, batch
    # padding + the wrapper-side BCE pad-row correction, and a nonzero bias.
    B2, D2, O2 = 40, 256, 16
    k1, k2, k3, k4 = jax.random.split(jax.random.PRNGKey(1), 4)
    f_s2 = jax.random.normal(k1, (B2, D2), dtype=jnp.float32)
    f_t2 = jax.random.normal(k2, (B2, D2), dtype=jnp.float32)
    w2 = jax.random.normal(k3, (O2, D2), dtype=jnp.float32)
    b2 = 0.3 * jax.random.normal(k4, (O2,), dtype=jnp.float32)
    loss2 = lsh_forward(f_s2, f_t2, w2, b2, with_l2=True, lsh_loss='BCE', tb=16)
    jax.block_until_ready(loss2)
    ref2 = lsh_forward_ref(f_s2, f_t2, w2, b2, with_l2=True, lsh_loss='BCE')
    assert jnp.allclose(loss2, ref2, rtol=1e-4, atol=1e-4), (loss2, ref2)

    # Case 3: bf16 features (sublane multiple 16), correlated student/teacher,
    # non-128-multiple output_dim (exercises the large-negative column padding).
    B3, D3, O3 = 40, 128, 24
    k5, k6, k7, k8 = jax.random.split(jax.random.PRNGKey(2), 4)
    f_s3 = jax.random.normal(k5, (B3, D3), dtype=jnp.float32)
    f_t3 = f_s3 + 0.05 * jax.random.normal(k6, (B3, D3), dtype=jnp.float32)
    w3 = jax.random.normal(k7, (O3, D3), dtype=jnp.float32)
    b3 = 0.1 * jax.random.normal(k8, (O3,), dtype=jnp.float32)
    f_s3b = f_s3.astype(jnp.bfloat16)
    f_t3b = f_t3.astype(jnp.bfloat16)
    loss3 = lsh_forward(f_s3b, f_t3b, w3, b3, with_l2=True, lsh_loss='BCE', tb=16)
    jax.block_until_ready(loss3)
    w3b = w3.astype(jnp.bfloat16).astype(jnp.float32)   # ref on the same rounded weights
    ref3 = lsh_forward_ref(f_s3b, f_t3b, w3b, b3, with_l2=True, lsh_loss='BCE')
    assert jnp.allclose(loss3, ref3, rtol=5e-3, atol=1e-3), (loss3, ref3)

    print("KERNEL_OK")
</pallas_src>

<mosaic_0001>
module attributes {stable_mosaic.version = 11 : i64} {
  func.func @_lsh_kernel(%arg0: i32, %arg1: i32, %arg2: memref<8x32xf32, #tpu.memory_space<vmem>>, %arg3: memref<8x32xf32, #tpu.memory_space<vmem>>, %arg4: memref<32x128xf32, #tpu.memory_space<vmem>>, %arg5: memref<1x128xf32, #tpu.memory_space<vmem>>, %arg6: memref<8x128xf32, #tpu.memory_space<vmem>>, %arg7: memref<1x32xf32, #tpu.memory_space<vmem>>, %arg8: memref<1x128xf32, #tpu.memory_space<vmem>>) attributes {dimension_semantics = [#tpu.dimension_semantics<parallel>, #tpu.dimension_semantics<arbitrary>], iteration_bounds = array<i64: 1, 1>, scalar_prefetch = 0 : i64, scratch_operands = 2 : i64, tpu.core_type = #tpu.core_type<tc>, window_params = [{transform_indices = @transform_0, window_bounds = array<i64: 8, 32>}, {transform_indices = @transform_1, window_bounds = array<i64: 8, 32>}, {pipeline_mode = #tpu.pipeline_mode<synchronous>, transform_indices = @transform_2, window_bounds = array<i64: 32, 128>}, {pipeline_mode = #tpu.pipeline_mode<synchronous>, transform_indices = @transform_3, window_bounds = array<i64: 1, 128>}, {transform_indices = @transform_4, window_bounds = array<i64: 8, 128>}]} {
    %c0_i32 = arith.constant 0 : i32
    %0 = arith.cmpi eq, %arg1, %c0_i32 : i32
    %1 = arith.extui %0 : i1 to i32
    %c0_i32_0 = arith.constant 0 : i32
    %2 = arith.cmpi ne, %1, %c0_i32_0 : i32
    scf.if %2 {
      %cst_24 = arith.constant 0.000000e+00 : f32
      %42 = vector.broadcast %cst_24 : f32 to vector<1x32xf32>
      %c0_25 = arith.constant 0 : index
      %c0_26 = arith.constant 0 : index
      %43 = vector.load %arg7[%c0_25, %c0_26] : memref<1x32xf32, #tpu.memory_space<vmem>>, vector<1x32xf32>
      tpu.vector_store %arg7[%c0_25, %c0_26], %42 {strides = array<i32>} : memref<1x32xf32, #tpu.memory_space<vmem>>, vector<1x32xf32>,
      %cst_27 = arith.constant 0.000000e+00 : f32
      %44 = vector.broadcast %cst_27 : f32 to vector<1x128xf32>
      %c0_28 = arith.constant 0 : index
      %c0_29 = arith.constant 0 : index
      %45 = vector.load %arg8[%c0_28, %c0_29] : memref<1x128xf32, #tpu.memory_space<vmem>>, vector<1x128xf32>
      tpu.vector_store %arg8[%c0_28, %c0_29], %44 {strides = array<i32>} : memref<1x128xf32, #tpu.memory_space<vmem>>, vector<1x128xf32>,
    } else {
    }
    %c0 = arith.constant 0 : index
    %c0_1 = arith.constant 0 : index
    %3 = vector.load %arg2[%c0, %c0_1] : memref<8x32xf32, #tpu.memory_space<vmem>>, vector<8x32xf32>
    %c0_2 = arith.constant 0 : index
    %c0_3 = arith.constant 0 : index
    %4 = vector.load %arg3[%c0_2, %c0_3] : memref<8x32xf32, #tpu.memory_space<vmem>>, vector<8x32xf32>
    %5 = arith.subf %3, %4 : vector<8x32xf32>
    %c0_4 = arith.constant 0 : index
    %c0_5 = arith.constant 0 : index
    %6 = vector.load %arg7[%c0_4, %c0_5] : memref<1x32xf32, #tpu.memory_space<vmem>>, vector<1x32xf32>
    %7 = arith.mulf %5, %5 : vector<8x32xf32>
    %cst = arith.constant dense<0.000000e+00> : vector<32xf32>
    %8 = vector.multi_reduction <add>, %7, %cst [0] : vector<8x32xf32> to vector<32xf32>
    %9 = vector.shape_cast %8 : vector<32xf32> to vector<1x32xf32>
    %10 = arith.addf %6, %9 : vector<1x32xf32>
    %c0_6 = arith.constant 0 : index
    %c0_7 = arith.constant 0 : index
    %11 = vector.load %arg7[%c0_6, %c0_7] : memref<1x32xf32, #tpu.memory_space<vmem>>, vector<1x32xf32>
    tpu.vector_store %arg7[%c0_6, %c0_7], %10 {strides = array<i32>} : memref<1x32xf32, #tpu.memory_space<vmem>>, vector<1x32xf32>,
    %c0_8 = arith.constant 0 : index
    %c0_9 = arith.constant 0 : index
    %12 = vector.load %arg4[%c0_8, %c0_9] : memref<32x128xf32, #tpu.memory_space<vmem>>, vector<32x128xf32>
    %c0_10 = arith.constant 0 : index
    %c0_11 = arith.constant 0 : index
    %13 = vector.load %arg5[%c0_10, %c0_11] : memref<1x128xf32, #tpu.memory_space<vmem>>, vector<1x128xf32>
    %cst_12 = arith.constant dense<0.000000e+00> : vector<8x128xf32>
    %14 = tpu.matmul %3, %12, %cst_12 {dimension_numbers = #tpu.dot_dimension_numbers<[1], [0], [0], [1], [0, 0, 1, 1], [], []>} : vector<8x32xf32>, vector<32x128xf32>, vector<8x128xf32> -> vector<8x128xf32>
    %15 = vector.broadcast %13 : vector<1x128xf32> to vector<8x128xf32>
    %16 = arith.addf %14, %15 : vector<8x128xf32>
    %cst_13 = arith.constant dense<0.000000e+00> : vector<8x128xf32>
    %17 = tpu.matmul %4, %12, %cst_13 {dimension_numbers = #tpu.dot_dimension_numbers<[1], [0], [0], [1], [0, 0, 1, 1], [], []>} : vector<8x32xf32>, vector<32x128xf32>, vector<8x128xf32> -> vector<8x128xf32>
    %18 = vector.broadcast %13 : vector<1x128xf32> to vector<8x128xf32>
    %19 = arith.addf %17, %18 : vector<8x128xf32>
    %cst_14 = arith.constant 0.000000e+00 : f32
    %20 = vector.broadcast %cst_14 : f32 to vector<8x128xf32>
    %21 = arith.cmpf ogt, %19, %20 : vector<8x128xf32>
    %22 = arith.extui %21 : vector<8x128xi1> to vector<8x128xi32>
    %23 = arith.sitofp %22 : vector<8x128xi32> to vector<8x128xf32>
    %cst_15 = arith.constant 0.000000e+00 : f32
    %24 = vector.broadcast %cst_15 : f32 to vector<8x128xf32>
    %25 = arith.maximumf %16, %24 : vector<8x128xf32>
    %26 = arith.mulf %16, %23 : vector<8x128xf32>
    %27 = arith.subf %25, %26 : vector<8x128xf32>
    %28 = math.absf %16 : vector<8x128xf32>
    %cst_16 = arith.constant 0.000000e+00 : f32
    %29 = vector.broadcast %cst_16 : f32 to vector<8x128xf32>
    %30 = arith.subf %29, %28 : vector<8x128xf32>
    %31 = math.exp %30 : vector<8x128xf32>
    %32 = math.log1p %31 : vector<8x128xf32>
    %33 = arith.addf %27, %32 : vector<8x128xf32>
    %c0_17 = arith.constant 0 : index
    %c0_18 = arith.constant 0 : index
    %34 = vector.load %arg8[%c0_17, %c0_18] : memref<1x128xf32, #tpu.memory_space<vmem>>, vector<1x128xf32>
    %cst_19 = arith.constant dense<0.000000e+00> : vector<128xf32>
    %35 = vector.multi_reduction <add>, %33, %cst_19 [0] : vector<8x128xf32> to vector<128xf32>
    %36 = vector.shape_cast %35 : vector<128xf32> to vector<1x128xf32>
    %37 = arith.addf %34, %36 : vector<1x128xf32>
    %c0_20 = arith.constant 0 : index
    %c0_21 = arith.constant 0 : index
    %38 = vector.load %arg8[%c0_20, %c0_21] : memref<1x128xf32, #tpu.memory_space<vmem>>, vector<1x128xf32>
    tpu.vector_store %arg8[%c0_20, %c0_21], %37 {strides = array<i32>} : memref<1x128xf32, #tpu.memory_space<vmem>>, vector<1x128xf32>,
    %c0_i32_22 = arith.constant 0 : i32
    %39 = arith.cmpi eq, %arg1, %c0_i32_22 : i32
    %40 = arith.extui %39 : i1 to i32
    %c0_i32_23 = arith.constant 0 : i32
    %41 = arith.cmpi ne, %40, %c0_i32_23 : i32
    scf.if %41 {
      %c0_24 = arith.constant 0 : index
      %c0_25 = arith.constant 0 : index
      %42 = vector.load %arg7[%c0_24, %c0_25] : memref<1x32xf32, #tpu.memory_space<vmem>>, vector<1x32xf32>
      %43 = vector.shape_cast %42 : vector<1x32xf32> to vector<1x1x32xf32>
      %cst_26 = arith.constant dense<0.000000e+00> : vector<1xf32>
      %44 = vector.multi_reduction <add>, %43, %cst_26 [1, 2] : vector<1x1x32xf32> to vector<1xf32>
      %45 = vector.shape_cast %44 : vector<1xf32> to vector<1x1x1xf32>
      %46 = vector.extract %45[0, 0, 0] : f32 from vector<1x1x1xf32>
      %c0_27 = arith.constant 0 : index
      %c0_28 = arith.constant 0 : index
      %47 = vector.load %arg8[%c0_27, %c0_28] : memref<1x128xf32, #tpu.memory_space<vmem>>, vector<1x128xf32>
      %48 = vector.shape_cast %47 : vector<1x128xf32> to vector<1x1x128xf32>
      %cst_29 = arith.constant dense<0.000000e+00> : vector<1xf32>
      %49 = vector.multi_reduction <add>, %48, %cst_29 [1, 2] : vector<1x1x128xf32> to vector<1xf32>
      %50 = vector.shape_cast %49 : vector<1xf32> to vector<1x1x1xf32>
      %51 = vector.extract %50[0, 0, 0] : f32 from vector<1x1x1xf32>
      %52 = tpu.iota {dimensions = array<i32: 1>} : vector<8x128xi32>
      %c0_i32_30 = arith.constant 0 : i32
      %53 = vector.broadcast %c0_i32_30 : i32 to vector<8x128xi32>
      %54 = arith.cmpi eq, %52, %53 : vector<8x128xi32>
      %c1_i32 = arith.constant 1 : i32
      %55 = vector.broadcast %c1_i32 : i32 to vector<8x128xi32>
      %56 = arith.cmpi eq, %52, %55 : vector<8x128xi32>
      %cst_31 = arith.constant 0.000000e+00 : f32
      %57 = vector.broadcast %51 : f32 to vector<8x128xf32>
      %58 = vector.broadcast %cst_31 : f32 to vector<8x128xf32>
      %59 = arith.select %56, %57, %58 : vector<8x128xi1>, vector<8x128xf32>
      %60 = vector.broadcast %46 : f32 to vector<8x128xf32>
      %61 = arith.select %54, %60, %59 : vector<8x128xi1>, vector<8x128xf32>
      %c0_32 = arith.constant 0 : index
      %c0_33 = arith.constant 0 : index
      %62 = vector.load %arg6[%c0_32, %c0_33] : memref<8x128xf32, #tpu.memory_space<vmem>>, vector<8x128xf32>
      tpu.vector_store %arg6[%c0_32, %c0_33], %61 {strides = array<i32>} : memref<8x128xf32, #tpu.memory_space<vmem>>, vector<8x128xf32>,
    } else {
    }
    return
  }
  func.func @transform_0(%arg0: i32, %arg1: i32) -> (i32, i32) {
    %c1_i32 = arith.constant 1 : i32
    %0 = arith.muli %arg0, %c1_i32 : i32
    %1 = arith.addi %0, %arg1 : i32
    %c0_i32 = arith.constant 0 : i32
    %c0_i32_0 = arith.constant 0 : i32
    return %1, %c0_i32 : i32, i32
  }
  func.func @transform_1(%arg0: i32, %arg1: i32) -> (i32, i32) {
    %c1_i32 = arith.constant 1 : i32
    %0 = arith.muli %arg0, %c1_i32 : i32
    %1 = arith.addi %0, %arg1 : i32
    %c0_i32 = arith.constant 0 : i32
    %c0_i32_0 = arith.constant 0 : i32
    return %1, %c0_i32 : i32, i32
  }
  func.func @transform_2(%arg0: i32, %arg1: i32) -> (i32, i32) {
    %c0_i32 = arith.constant 0 : i32
    %c0_i32_0 = arith.constant 0 : i32
    %c0_i32_1 = arith.constant 0 : i32
    return %c0_i32, %c0_i32_0 : i32, i32
  }
  func.func @transform_3(%arg0: i32, %arg1: i32) -> (i32, i32) {
    %c0_i32 = arith.constant 0 : i32
    %c0_i32_0 = arith.constant 0 : i32
    %c0_i32_1 = arith.constant 0 : i32
    return %c0_i32, %c0_i32_0 : i32, i32
  }
  func.func @transform_4(%arg0: i32, %arg1: i32) -> (i32, i32) {
    %c0_i32 = arith.constant 0 : i32
    %c0_i32_0 = arith.constant 0 : i32
    return %arg0, %c0_i32 : i32, i32
  }
}

</mosaic_0001>

<bundles_post_ra>
// kernel: tpu_custom_call.1
= control target key start
LH: loop header
LB: loop body
LE: loop exit
PB: predicated region body
PF: predicated region fallthrough
CT: control target
= control target key end

     0   :  { %9 = vsyncpa [#allocation5], 0  ;;  %s567_s0 = inlined_call_operand.hbm [shape: f32[8,32], index: 0, kind: input, shape index: {}]   ;;  %s568_s1 = inlined_call_operand.hbm [shape: f32[8,32], index: 1, kind: input, shape index: {}]   ;;  %s569_s2 = inlined_call_operand.hbm [shape: f32[32,128], index: 2, kind: input, shape index: {}]   ;;  %s570_s3 = inlined_call_operand.vmem [shape: f32[1,128], index: 3, kind: input, shape index: {}]   ;;  %s571_s4 = inlined_call_operand.hbm [shape: f32[8,128], index: 4, kind: output, shape index: {}]  }
   0x1   :  { %10 = vsyncpa [#allocation8], 0 }
   0x2   :  { %11 = vsyncpa [#allocation6], 0  ;;  %s482_s15 = smov [#allocation7]   ;;  %s483_s17 = smov [#allocation4]  }
   0x3   :  { %s34_s16 = sshll.u32 %s482_s15, 4  ;;  %s21_s18 = sshll.u32 %s483_s17, 4  ;;  %s35_s16 = int_to_ptr.vmem [resolvable:$true] %s34_s16  ;;  %s22_s18 = int_to_ptr.vmem [resolvable:$true] %s21_s18 }
   0x4   :  { %s388_s21 = scalar_lea.hbm %s568_s1, 128 }
   0x5   :  { %p389_p0 = scmp.ne.s32.totalorder %s568_s1, %s388_s21  ;;  %p392_p1 = scmp.lt.u32.totalorder %s388_s21, %s568_s1 }
   0x7   :  { %p394_p2 = pnand %p392_p1, %p389_p0 }
   0x9   :  { %397 = shalt.err (!%p394_p2)
}
   0xa   :  { %s398_s26 = scalar_lea.vmem %s35_s16, 128  ;;  %p403_p4 = scmp.lt.s32.totalorder %s35_s16, %s35_s16 }
   0xb   :  { %p399_p3 = scmp.ne.s32.totalorder %s35_s16, %s398_s26  ;;  %p404_p5 = scmp.lt.s32.totalorder %s398_s26, %s398_s26 }
   0xd   :  { %p405_p6 = por %p404_p5, %p403_p4 }
   0xf   :  { %p406_p7 = pnand %p405_p6, %p399_p3 }
  0x11   :  { %409 = shalt.err (!%p406_p7)
}
  0x12   :  { %37 = dma.hbm_to_vmem [thread:$0]  %s568_s1, 128, %s35_s16, [#allocation8]  }
  0x13   :  { %s410_s5 = scalar_lea.hbm %s567_s0, 128 }
  0x14   :  { %p411_p8 = scmp.ne.s32.totalorder %s567_s0, %s410_s5  ;;  %p414_p9 = scmp.lt.u32.totalorder %s410_s5, %s567_s0 }
  0x16   :  { %p416_p10 = pnand %p414_p9, %p411_p8 }
  0x18   :  { %419 = shalt.err (!%p416_p10)
}
  0x19   :  { %s420_s10 = scalar_lea.vmem %s22_s18, 128  ;;  %p425_p12 = scmp.lt.s32.totalorder %s22_s18, %s22_s18 }
  0x1a   :  { %p421_p11 = scmp.ne.s32.totalorder %s22_s18, %s420_s10  ;;  %p426_p13 = scmp.lt.s32.totalorder %s420_s10, %s420_s10 }
  0x1c   :  { %p427_p0 = por %p426_p13, %p425_p12 }
  0x1e   :  { %p428_p1 = pnand %p427_p0, %p421_p11 }
  0x20   :  { %431 = shalt.err (!%p428_p1)
}
  0x21   :  { %24 = dma.hbm_to_vmem [thread:$0]  %s567_s0, 128, %s22_s18, [#allocation5]  }
  0x22   :  { %s484_s12 = smov [#allocation9]   ;;  %s432_s16 = scalar_lea.hbm %s569_s2, 512 }
  0x23   :  { %s43_s13 = sshll.u32 %s484_s12, 4  ;;  %p433_p2 = scmp.ne.s32.totalorder %s569_s2, %s432_s16  ;;  %s44_s13 = int_to_ptr.vmem [resolvable:$true] %s43_s13 }
  0x24   :  { %p436_p3 = scmp.lt.u32.totalorder %s432_s16, %s569_s2 }
  0x26   :  { %p438_p4 = pnand %p436_p3, %p433_p2 }
  0x28   :  { %441 = shalt.err (!%p438_p4)
}
  0x29   :  { %s442_s22 = scalar_lea.vmem %s44_s13, 512  ;;  %p447_p6 = scmp.lt.s32.totalorder %s44_s13, %s44_s13 }
  0x2a   :  { %p443_p5 = scmp.ne.s32.totalorder %s44_s13, %s442_s22  ;;  %p448_p7 = scmp.lt.s32.totalorder %s442_s22, %s442_s22 }
  0x2c   :  { %p449_p8 = por %p448_p7, %p447_p6 }
  0x2e   :  { %p450_p9 = pnand %p449_p8, %p443_p5 }
  0x30   :  { %453 = shalt.err (!%p450_p9)
}
  0x31   :  { %s485_s0 = smov 128   ;;  %s486_s18 = smov 8  }
  0x32   :  { %49 = dma.hbm_to_vmem [thread:$0]  %s569_s2, 512, %s44_s13, [#allocation8], %s485_s0, %s485_s0, %s486_s18  }
  0x33   :  { %476 = dma.done.wait [#allocation5], 128  }
  0x34   :  { %477 = vsyncadd [#allocation5], 4294967168 }
  0x35   :  { %478 = dma.done.wait [#allocation8], 640  }
  0x36   :  { %479 = vsyncadd [#allocation8], 4294966656  ;;  %v487_v0 = vmov 0.0|0.0   ;;  %v488_v1 = vmov 0.0   ;;  %vm489_vm0 = vmmov 0   ;;  %v86_v2 = vld [vmem:[#allocation9] sm:$0xff] }
  0x37   :  { %359 = vmatprep.subr.bf16.mxu0 %v487_v0  ;;  %365 = vmatprep.subr.bf16.mxu1 %v487_v0  ;;  %69 = vst [vmem:[#allocation3] sm:$0x1] %v488_v1  ;;  %v87_v3 = vld [vmem:[#allocation9 + $0x8] sm:$0xff]  ;;  %v88_v4 = vld [vmem:[#allocation9 + $0x10] sm:$0xff]  ;;  %v89_v6 = vld [vmem:[#allocation9 + $0x18] sm:$0xff]  ;;  %vm75_vm1 = vcmask 261120  }
  0x38   :  { %345 = vmatprep.mubr.msk.f32.mxu0 %vm489_vm0, %v488_v1  ;;  %356 = vmatprep.mubr.msk.f32.mxu1 %vm489_vm0, %v488_v1  ;;  %v360_v5 = vpack.c.bf16 %v87_v3, %v86_v2  ;;  %v70_v7 = vld [vmem:[#allocation4] sm:$0xff]  ;;  %v71_v8 = vld [vmem:[#allocation7] sm:$0xff]  ;;  %v363_v10 = vpack.c.bf16 %v89_v6, %v88_v4  ;;  %vm67_vm2 = vcmask 253952   ;;  %v323_v23 = vld [vmem:[%s570_s3] ss:$0 sm:$0xff]  ;;  %vm287_vm5 = vcmask 1040384  }
  0x39   :  { %v72_v9 = vsub.f32 %v70_v7, %v71_v8  ;;  %68 = vst.msk [vmem:[#allocation2] sm:$0x1] %vm67_vm2, %v488_v1  ;;  %s490_s26 = smov [#allocation10]  }
  0x3a   :  { %361 = vmatpush3.bf16.msra.mxu0 %v360_v5  ;;  %367 = vmatpush3.bf16.msra.mxu1 %v360_v5  ;;  %s313_s27 = sshll.u32 %s490_s26, 4  ;;  %s314_s27 = int_to_ptr.vmem [resolvable:$true] %s313_s27 }
  0x3b   :  { %362 = vmatprep.subr.bf16.mxu0 %v487_v0  ;;  %368 = vmatprep.subr.bf16.mxu1 %v487_v0  ;;  %v74_v11 = vmul.f32 %v72_v9, %v72_v9  ;;  %s454_s29 = scalar_lea.vmem %s314_s27, 128  ;;  %p459_p11 = scmp.lt.s32.totalorder %s314_s27, %s314_s27 }
  0x3c   :  { %p455_p10 = scmp.ne.s32.totalorder %s314_s27, %s454_s29  ;;  %p460_p12 = scmp.lt.s32.totalorder %s454_s29, %s454_s29 }
  0x3d   :  { %v76_v12 = vsel %vm75_vm1, %v74_v11, 0.0 }
  0x3e   :  { %364 = vmatpush3.bf16.msra.mxu0 %v363_v10  ;;  %370 = vmatpush3.bf16.msra.mxu1 %v363_v10  ;;  %v77_v13 = vrot.slane %v76_v12, 4  ;;  %v263_v52 = vld [vmem:[#allocation3] sm:$0x1]  ;;  %p461_p13 = por %p460_p12, %p459_p11 }
  0x40   :  { %v78_v14 = vadd.f32 %v77_v13, %v76_v12  ;;  %v73_v19 = vld [vmem:[#allocation2] sm:$0x1]  ;;  %p462_p0 = pnand %p461_p13, %p455_p10 }
  0x41   :  { %346 = vmatmul.mubr.msk.f32.vlgmr.msra.gmra.mrb[0].mxu0 %vm75_vm1, %v70_v7  ;;  %357 = vmatmul.mubr.msk.f32.vlgmr.msra.gmra.mrb[0].mxu1 %vm75_vm1, %v71_v8  ;;  %v298_v7 = vlaneseq }
  0x42   :  { %v79_v15 = vrot.slane %v78_v14, 2 }
  0x43   :  { %v299_v8 = vand.u32 127, %v298_v7 }
  0x44   :  { %v80_v16 = vadd.f32 %v79_v15, %v78_v14 }
  0x45   :  { %vm301_vm6 = vcmp.eq.s32.totalorder %v299_v8, 1  ;;  %vm300_vm7 = vcmp.eq.s32.totalorder %v299_v8, 0 }
  0x46   :  { %v81_v17 = vrot.slane %v80_v16, 1 }
  0x48   :  { %v82_v18 = vadd.f32 %v81_v17, %v80_v16 }
  0x4a   :  { %v83_v20 = vadd.f32 %v82_v18, %v73_v19 }
  0x4c   :  { %85 = vst.msk [vmem:[#allocation2] sm:$0x1] %vm67_vm2, %v83_v20 }
  0x53   :  { %v275_v21 = vld [vmem:[#allocation2] sm:$0x1] }
  0x54   :  { %v276_v22 = vsel %vm67_vm2, %v275_v21, 0.0 }
  0x55   :  { %277 = vadd.xlane.f32.xlu0 %v276_v22 }
  0xe2   :  { %v278_v57 = vpop.xlane.xlu0 %277 }
  0xe3   :  { %v279_v58 = vrot.slane %v278_v57, 4 }
  0xe5   :  { %v280_v59 = vadd.f32 %v279_v58, %v278_v57 }
  0xe7   :  { %v281_v60 = vrot.slane %v280_v59, 2 }
  0xe9   :  { %v282_v61 = vadd.f32 %v281_v60, %v280_v59 }
  0xeb   :  { %v283_v62 = vrot.slane %v282_v61, 1 }
  0xed   :  { %v284_v63 = vadd.f32 %v283_v62, %v282_v61 }
  0xef   :  { %371 = vpush %v284_v63 }
 0x114   :  { %v166_v24 = vpop.f32.mrb[0].mxu0  ;;  %v239_v25 = vpop.f32.mrb[0].mxu1 }
 0x115   :  { %v167_v26 = vadd.f32 %v323_v23, %v166_v24  ;;  %v240_v27 = vadd.f32 %v323_v23, %v239_v25  ;;  %v347_v28 = vpop.f32.mrb[1].mxu0  ;;  %v358_v29 = vpop.f32.mrb[1].mxu1 }
 0x117   :  { %v249_v30 = vand.u32 2147483647, %v167_v26  ;;  %vm243_vm3 = vcmp.gt.f32.partialorder %v240_v27, 0.0  ;;  %v246_v32 = vmax.f32 %v167_v26, 0.0 }
 0x118   :  { %v326_v31 = vsel %vm243_vm3, 1.0, %v488_v1 }
 0x119   :  { %v250_v33 = vsub.f32 0.0, %v249_v30  ;;  %v247_v34 = vmul.f32 %v326_v31, %v167_v26 }
 0x11b   :  { %v251_v35 = vmul.f32 1.442695, %v250_v33  ;;  %v248_v36 = vsub.f32 %v246_v32, %v247_v34 }
 0x11d   :  { %384 = vpow2.f32 %v251_v35 }
 0x120   :  { %s372_s3 = spop %371 }
 0x121   :  { %v304_v10 = vstv %s372_s3 }
 0x127   :  { %v385_v37 = vpop.eup %384 }
 0x128   :  { %v253_v38 = vadd.f32 1.0, %v385_v37  ;;  %v256_v39 = vmul.f32 -0.5, %v385_v37  ;;  %v259_v41 = vand.u32 2147483647, %v385_v37 }
 0x12a   :  { %386 = vlog2.f32 %v253_v38  ;;  %v257_v40 = vadd.f32 1.0, %v256_v39  ;;  %vm260_vm4 = vcmp.lt.f32.partialorder %v259_v41, 0.0004427343 }
 0x12c   :  { %v258_v44 = vmul.f32 %v385_v37, %v257_v40 }
 0x134   :  { %v387_v42 = vpop.eup %386 }
 0x135   :  { %v255_v43 = vmul.f32 0.6931472, %v387_v42 }
 0x137   :  { %v261_v45 = vsel %vm260_vm4, %v258_v44, %v255_v43 }
 0x138   :  { %v262_v46 = vadd.f32 %v261_v45, %v248_v36 }
 0x13a   :  { %v264_v47 = vrot.slane %v262_v46, 4 }
 0x13c   :  { %v265_v48 = vadd.f32 %v264_v47, %v262_v46 }
 0x13e   :  { %v266_v49 = vrot.slane %v265_v48, 2 }
 0x140   :  { %v267_v50 = vadd.f32 %v266_v49, %v265_v48 }
 0x142   :  { %v268_v51 = vrot.slane %v267_v50, 1 }
 0x144   :  { %v269_v53 = vadd.f32 %v268_v51, %v267_v50 }
 0x146   :  { %v270_v54 = vadd.f32 %v269_v53, %v263_v52 }
 0x148   :  { %271 = vst [vmem:[#allocation3] sm:$0x1] %v270_v54 }
 0x14f   :  { %v286_v55 = vld [vmem:[#allocation3] sm:$0x1] }
 0x150   :  { %v288_v56 = vsel %vm287_vm5, %v286_v55, 0.0 }
 0x151   :  { %289 = vadd.xlane.f32.xlu0 %v288_v56 }
 0x1de   :  { %v290_v0 = vpop.xlane.xlu0 %289 }
 0x1df   :  { %v291_v1 = vrot.slane %v290_v0, 4 }
 0x1e1   :  { %v292_v2 = vadd.f32 %v291_v1, %v290_v0 }
 0x1e3   :  { %v293_v3 = vrot.slane %v292_v2, 2 }
 0x1e5   :  { %v294_v4 = vadd.f32 %v293_v3, %v292_v2 }
 0x1e7   :  { %v295_v5 = vrot.slane %v294_v4, 1 }
 0x1e9   :  { %v296_v6 = vadd.f32 %v295_v5, %v294_v4 }
 0x1eb   :  { %373 = vpush %v296_v6 }
 0x21c   :  { %s374_s28 = spop %373 }
 0x21d   :  { %v302_v9 = vstv %s374_s28 }
 0x21e   :  { %v303_v11 = vsel %vm301_vm6, %v302_v9, 0.0 }
 0x21f   :  { %v305_v12 = vsel %vm300_vm7, %v304_v10, %v303_v11 }
 0x220   :  { %306 = vst [vmem:[#allocation10] sm:$0xff] %v305_v12 }
 0x221   :  { %465 = shalt.err (!%p462_p0)
}
 0x222   :  { %s466_s6 = scalar_lea.hbm %s571_s4, 128 }
 0x223   :  { %p467_p1 = scmp.ne.s32.totalorder %s571_s4, %s466_s6  ;;  %p470_p2 = scmp.lt.u32.totalorder %s466_s6, %s571_s4 }
 0x225   :  { %p472_p3 = pnand %p470_p2, %p467_p1 }
 0x227   :  { %475 = shalt.err (!%p472_p3)
}
 0x228   :  { %316 = dma.vmem_to_hbm [thread:$0]  %s314_s27, 128, %s571_s4, [#allocation6]  }
 0x229   :  { %480 = dma.done.wait [#allocation6], 128  }
 0x22a   :  { %481 = vsyncadd [#allocation6], 4294967168 }
 0x22b   :  { %320 = vsyncpa [#allocation5], 1 }
 0x22c   :  { %321 = vsyncpa [#allocation8], 1 }
 0x22d   :  { %322 = vsyncpa [#allocation6], 1 }

</bundles_post_ra>
